<compile_context>
chip_gen: v6e
topology: v6e:2x2x1
jax: 0.10.0
libtpu: 0.0.40
codegen_flags: <defaults>
</compile_context>

<pallas_src>
import math

import jax
import jax.numpy as jnp
from jax.experimental import pallas as pl
from jax.experimental.pallas import tpu as pltpu


_NEG_HALF_LOG_2PI = -0.5 * math.log(2.0 * math.pi)


def _encoder_logprob_kernel(x_ref, w1_ref, b1_ref, w2_ref, b2_ref,
                            w3v_ref, b3v_ref, eps_ref, out_ref):
    # ---- encoder_net MLP (MXU matmuls, f32 accumulation) ----
    h = jnp.dot(x_ref[...], w1_ref[...],
                preferred_element_type=jnp.float32) + b1_ref[...]
    h = jnp.maximum(h, 0.01 * h).astype(w2_ref.dtype)        # LeakyReLU(0.01)

    h = jnp.dot(h, w2_ref[...],
                preferred_element_type=jnp.float32) + b2_ref[...]
    h = jnp.maximum(h, 0.01 * h).astype(w3v_ref.dtype)       # LeakyReLU(0.01)

    # Layer 3: only the log_var half of the output head is needed, because
    # log_normal_diag(z, mu, log_var) with z = mu + exp(0.5*log_var)*eps
    # simplifies exactly to  -0.5*log(2*pi) - 0.5*log_var - 0.5*eps^2
    # (mu cancels:  exp(-log_var)*(z-mu)^2 == eps^2).
    log_var = jnp.dot(h, w3v_ref[...],
                      preferred_element_type=jnp.float32) + b3v_ref[...]

    eps = eps_ref[...]
    out_ref[...] = (_NEG_HALF_LOG_2PI
                    - 0.5 * log_var
                    - 0.5 * eps * eps).astype(out_ref.dtype)


def _round_up(n, m):
    return ((n + m - 1) // m) * m


def encoder_log_prob(x, params, eps, *, tb=256, weights_dtype=jnp.bfloat16):
    """Fused forward pass of Encoder(x, type='log_prob'). Returns [B, L] f32.

    tb: batch tile (256 for v6e/v7x, 128 for v5e); clipped for small batches.
    weights_dtype: dtype of the matmul operands (bf16 halves weight DMA;
                   accumulation + epilogue stay f32).
    """
    w1, b1, w2, b2, w3, b3 = params
    B, D = x.shape
    M = w1.shape[1]
    L = w3.shape[1] // 2

    # Only the log_var half of layer 3 is needed (mu is dead in the output).
    w3v = w3[:, L:]
    b3v = b3[:, L:]

    # Narrow the matmul operands; biases / eps / epilogue stay f32.
    x_c = x.astype(weights_dtype)
    w1_c = w1.astype(weights_dtype)
    w2_c = w2.astype(weights_dtype)
    w3v_c = w3v.astype(weights_dtype)
    b1_f = b1.astype(jnp.float32)
    b2_f = b2.astype(jnp.float32)
    b3v_f = b3v.astype(jnp.float32)
    eps_f = eps.astype(jnp.float32)

    # 1-D grid over the batch; weights/biases pinned in VMEM across grid steps.
    tb = min(tb, _round_up(B, 8))
    b_pad = _round_up(B, tb)
    if b_pad != B:
        x_c = jnp.pad(x_c, ((0, b_pad - B), (0, 0)))
        eps_f = jnp.pad(eps_f, ((0, b_pad - B), (0, 0)))
    n_b = b_pad // tb

    def batch_spec(cols):
        return pl.BlockSpec((tb, cols), lambda i: (i, 0))

    def pinned_spec(shape):
        return pl.BlockSpec(shape, lambda i: (0, 0))

    w_isz = jnp.dtype(weights_dtype).itemsize
    cost = pl.CostEstimate(
        flops=2 * b_pad * (D * M + M * M + M * L) + 8 * b_pad * (2 * M + L),
        transcendentals=0,
        bytes_accessed=(b_pad * D * w_isz                      # x
                        + (D * M + M * M + M * L) * w_isz      # weights
                        + (2 * M + L) * 4                      # biases
                        + b_pad * L * 4                        # eps
                        + b_pad * L * 4))                      # out

    out = pl.pallas_call(
        _encoder_logprob_kernel,
        out_shape=jax.ShapeDtypeStruct((b_pad, L), jnp.float32),
        grid_spec=pltpu.PrefetchScalarGridSpec(
            num_scalar_prefetch=0,
            grid=(n_b,),
            in_specs=[
                batch_spec(D),          # x        [tb, D]
                pinned_spec((D, M)),    # w1
                pinned_spec((1, M)),    # b1
                pinned_spec((M, M)),    # w2
                pinned_spec((1, M)),    # b2
                pinned_spec((M, L)),    # w3 (log_var half)
                pinned_spec((1, L)),    # b3 (log_var half)
                batch_spec(L),          # eps      [tb, L]
            ],
            out_specs=pl.BlockSpec((tb, L), lambda i: (i, 0)),
        ),
        compiler_params=pltpu.CompilerParams(
            dimension_semantics=("parallel",)),
        cost_estimate=cost,
    )(x_c, w1_c, b1_f, w2_c, b2_f, w3v_c, b3v_f, eps_f)

    return out[:B]


def _reference_log_prob(x, params, eps):
    """Pure-JAX f32 reference (mirrors the PyTorch semantics, un-simplified)."""
    w1, b1, w2, b2, w3, b3 = params
    h = x @ w1 + b1
    h = jnp.where(h > 0, h, 0.01 * h)
    h = h @ w2 + b2
    h = jnp.where(h > 0, h, 0.01 * h)
    h = h @ w3 + b3
    L = w3.shape[1] // 2
    mu, log_var = h[:, :L], h[:, L:]
    z = mu + jnp.exp(0.5 * log_var) * eps
    return (-0.5 * jnp.log(2.0 * jnp.pi)
            - 0.5 * log_var
            - 0.5 * jnp.exp(-log_var) * (z - mu) ** 2)


def make_params(key, D, M, L):
    """Deterministic synthetic parameters (shapes from the implied encoder_net)."""
    ks = jax.random.split(key, 6)

    def lin(kw, kb, fan_in, fan_out):
        bound = 1.0 / math.sqrt(fan_in)
        w = jax.random.uniform(kw, (fan_in, fan_out), jnp.float32, -bound, bound)
        b = jax.random.uniform(kb, (1, fan_out), jnp.float32, -bound, bound)
        return w, b

    w1, b1 = lin(ks[0], ks[1], D, M)
    w2, b2 = lin(ks[2], ks[3], M, M)
    w3, b3 = lin(ks[4], ks[5], M, 2 * L)
    return (w1, b1, w2, b2, w3, b3)


if __name__ == "__main__":
    B, D, M, L = 8, 256, 256, 128   # batch, input dim, hidden, latent

    key = jax.random.PRNGKey(0)
    k_x, k_p, k_eps = jax.random.split(key, 3)

    x = jax.random.normal(k_x, (B, D), jnp.float32)
    params = make_params(k_p, D, M, L)
    # eps ~ N(0,1): torch.randn_like analog, generated in the host wrapper.
    eps = jax.random.normal(k_eps, (B, L), jnp.float32)

    ref = _reference_log_prob(x, params, eps)

    # f32 matmul path: matches the PyTorch math (simplification is exact).
    out_f32 = jax.block_until_ready(
        encoder_log_prob(x, params, eps, weights_dtype=jnp.float32))
    assert out_f32.shape == (B, L)
    assert jnp.allclose(out_f32, ref, atol=1e-4, rtol=1e-4)

    # bf16-weight fast path (f32 accumulation + f32 epilogue).
    out_bf16 = jax.block_until_ready(
        encoder_log_prob(x, params, eps, weights_dtype=jnp.bfloat16))
    assert out_bf16.shape == (B, L)
    assert jnp.allclose(out_bf16, ref, atol=5e-2, rtol=5e-2)

    print("KERNEL_OK")
</pallas_src>

<mosaic_0001>
module attributes {stable_mosaic.version = 11 : i64} {
  func.func @_encoder_logprob_kernel(%arg0: i32, %arg1: memref<8x256xf32, #tpu.memory_space<vmem>>, %arg2: memref<256x256xf32, #tpu.memory_space<vmem>>, %arg3: memref<1x256xf32, #tpu.memory_space<vmem>>, %arg4: memref<256x256xf32, #tpu.memory_space<vmem>>, %arg5: memref<1x256xf32, #tpu.memory_space<vmem>>, %arg6: memref<256x128xf32, #tpu.memory_space<vmem>>, %arg7: memref<1x128xf32, #tpu.memory_space<vmem>>, %arg8: memref<8x128xf32, #tpu.memory_space<vmem>>, %arg9: memref<8x128xf32, #tpu.memory_space<vmem>>) attributes {dimension_semantics = [#tpu.dimension_semantics<parallel>], iteration_bounds = array<i64: 1>, scalar_prefetch = 0 : i64, scratch_operands = 0 : i64, tpu.core_type = #tpu.core_type<tc>, window_params = [{transform_indices = @transform_0, window_bounds = array<i64: 8, 256>}, {pipeline_mode = #tpu.pipeline_mode<synchronous>, transform_indices = @transform_1, window_bounds = array<i64: 256, 256>}, {pipeline_mode = #tpu.pipeline_mode<synchronous>, transform_indices = @transform_2, window_bounds = array<i64: 1, 256>}, {pipeline_mode = #tpu.pipeline_mode<synchronous>, transform_indices = @transform_3, window_bounds = array<i64: 256, 256>}, {pipeline_mode = #tpu.pipeline_mode<synchronous>, transform_indices = @transform_4, window_bounds = array<i64: 1, 256>}, {pipeline_mode = #tpu.pipeline_mode<synchronous>, transform_indices = @transform_5, window_bounds = array<i64: 256, 128>}, {pipeline_mode = #tpu.pipeline_mode<synchronous>, transform_indices = @transform_6, window_bounds = array<i64: 1, 128>}, {transform_indices = @transform_7, window_bounds = array<i64: 8, 128>}, {transform_indices = @transform_8, window_bounds = array<i64: 8, 128>}]} {
    %c0 = arith.constant 0 : index
    %c0_0 = arith.constant 0 : index
    %0 = vector.load %arg1[%c0, %c0_0] : memref<8x256xf32, #tpu.memory_space<vmem>>, vector<8x256xf32>
    %c0_1 = arith.constant 0 : index
    %c0_2 = arith.constant 0 : index
    %1 = vector.load %arg2[%c0_1, %c0_2] : memref<256x256xf32, #tpu.memory_space<vmem>>, vector<256x256xf32>
    %cst = arith.constant dense<0.000000e+00> : vector<8x256xf32>
    %2 = tpu.matmul %0, %1, %cst {dimension_numbers = #tpu.dot_dimension_numbers<[1], [0], [0], [1], [0, 0, 1, 1], [], []>} : vector<8x256xf32>, vector<256x256xf32>, vector<8x256xf32> -> vector<8x256xf32>
    %c0_3 = arith.constant 0 : index
    %c0_4 = arith.constant 0 : index
    %3 = vector.load %arg3[%c0_3, %c0_4] : memref<1x256xf32, #tpu.memory_space<vmem>>, vector<1x256xf32>
    %4 = vector.broadcast %3 : vector<1x256xf32> to vector<8x256xf32>
    %5 = arith.addf %2, %4 : vector<8x256xf32>
    %cst_5 = arith.constant 0.00999999977 : f32
    %6 = vector.broadcast %cst_5 : f32 to vector<8x256xf32>
    %7 = arith.mulf %6, %5 : vector<8x256xf32>
    %8 = arith.maximumf %5, %7 : vector<8x256xf32>
    %c0_6 = arith.constant 0 : index
    %c0_7 = arith.constant 0 : index
    %9 = vector.load %arg4[%c0_6, %c0_7] : memref<256x256xf32, #tpu.memory_space<vmem>>, vector<256x256xf32>
    %cst_8 = arith.constant dense<0.000000e+00> : vector<8x256xf32>
    %10 = tpu.matmul %8, %9, %cst_8 {dimension_numbers = #tpu.dot_dimension_numbers<[1], [0], [0], [1], [0, 0, 1, 1], [], []>} : vector<8x256xf32>, vector<256x256xf32>, vector<8x256xf32> -> vector<8x256xf32>
    %c0_9 = arith.constant 0 : index
    %c0_10 = arith.constant 0 : index
    %11 = vector.load %arg5[%c0_9, %c0_10] : memref<1x256xf32, #tpu.memory_space<vmem>>, vector<1x256xf32>
    %12 = vector.broadcast %11 : vector<1x256xf32> to vector<8x256xf32>
    %13 = arith.addf %10, %12 : vector<8x256xf32>
    %cst_11 = arith.constant 0.00999999977 : f32
    %14 = vector.broadcast %cst_11 : f32 to vector<8x256xf32>
    %15 = arith.mulf %14, %13 : vector<8x256xf32>
    %16 = arith.maximumf %13, %15 : vector<8x256xf32>
    %c0_12 = arith.constant 0 : index
    %c0_13 = arith.constant 0 : index
    %17 = vector.load %arg6[%c0_12, %c0_13] : memref<256x128xf32, #tpu.memory_space<vmem>>, vector<256x128xf32>
    %cst_14 = arith.constant dense<0.000000e+00> : vector<8x128xf32>
    %18 = tpu.matmul %16, %17, %cst_14 {dimension_numbers = #tpu.dot_dimension_numbers<[1], [0], [0], [1], [0, 0, 1, 1], [], []>} : vector<8x256xf32>, vector<256x128xf32>, vector<8x128xf32> -> vector<8x128xf32>
    %c0_15 = arith.constant 0 : index
    %c0_16 = arith.constant 0 : index
    %19 = vector.load %arg7[%c0_15, %c0_16] : memref<1x128xf32, #tpu.memory_space<vmem>>, vector<1x128xf32>
    %20 = vector.broadcast %19 : vector<1x128xf32> to vector<8x128xf32>
    %21 = arith.addf %18, %20 : vector<8x128xf32>
    %c0_17 = arith.constant 0 : index
    %c0_18 = arith.constant 0 : index
    %22 = vector.load %arg8[%c0_17, %c0_18] : memref<8x128xf32, #tpu.memory_space<vmem>>, vector<8x128xf32>
    %cst_19 = arith.constant 5.000000e-01 : f32
    %23 = vector.broadcast %cst_19 : f32 to vector<8x128xf32>
    %24 = arith.mulf %23, %21 : vector<8x128xf32>
    %cst_20 = arith.constant -0.918938517 : f32
    %25 = vector.broadcast %cst_20 : f32 to vector<8x128xf32>
    %26 = arith.subf %25, %24 : vector<8x128xf32>
    %cst_21 = arith.constant 5.000000e-01 : f32
    %27 = vector.broadcast %cst_21 : f32 to vector<8x128xf32>
    %28 = arith.mulf %27, %22 : vector<8x128xf32>
    %29 = arith.mulf %28, %22 : vector<8x128xf32>
    %30 = arith.subf %26, %29 : vector<8x128xf32>
    %c0_22 = arith.constant 0 : index
    %c0_23 = arith.constant 0 : index
    %31 = vector.load %arg9[%c0_22, %c0_23] : memref<8x128xf32, #tpu.memory_space<vmem>>, vector<8x128xf32>
    tpu.vector_store %arg9[%c0_22, %c0_23], %30 {strides = array<i32>} : memref<8x128xf32, #tpu.memory_space<vmem>>, vector<8x128xf32>,
    return
  }
  func.func @transform_0(%arg0: i32) -> (i32, i32) {
    %c0_i32 = arith.constant 0 : i32
    %c0_i32_0 = arith.constant 0 : i32
    return %arg0, %c0_i32 : i32, i32
  }
  func.func @transform_1(%arg0: i32) -> (i32, i32) {
    %c0_i32 = arith.constant 0 : i32
    %c0_i32_0 = arith.constant 0 : i32
    %c0_i32_1 = arith.constant 0 : i32
    return %c0_i32, %c0_i32_0 : i32, i32
  }
  func.func @transform_2(%arg0: i32) -> (i32, i32) {
    %c0_i32 = arith.constant 0 : i32
    %c0_i32_0 = arith.constant 0 : i32
    %c0_i32_1 = arith.constant 0 : i32
    return %c0_i32, %c0_i32_0 : i32, i32
  }
  func.func @transform_3(%arg0: i32) -> (i32, i32) {
    %c0_i32 = arith.constant 0 : i32
    %c0_i32_0 = arith.constant 0 : i32
    %c0_i32_1 = arith.constant 0 : i32
    return %c0_i32, %c0_i32_0 : i32, i32
  }
  func.func @transform_4(%arg0: i32) -> (i32, i32) {
    %c0_i32 = arith.constant 0 : i32
    %c0_i32_0 = arith.constant 0 : i32
    %c0_i32_1 = arith.constant 0 : i32
    return %c0_i32, %c0_i32_0 : i32, i32
  }
  func.func @transform_5(%arg0: i32) -> (i32, i32) {
    %c0_i32 = arith.constant 0 : i32
    %c0_i32_0 = arith.constant 0 : i32
    %c0_i32_1 = arith.constant 0 : i32
    return %c0_i32, %c0_i32_0 : i32, i32
  }
  func.func @transform_6(%arg0: i32) -> (i32, i32) {
    %c0_i32 = arith.constant 0 : i32
    %c0_i32_0 = arith.constant 0 : i32
    %c0_i32_1 = arith.constant 0 : i32
    return %c0_i32, %c0_i32_0 : i32, i32
  }
  func.func @transform_7(%arg0: i32) -> (i32, i32) {
    %c0_i32 = arith.constant 0 : i32
    %c0_i32_0 = arith.constant 0 : i32
    return %arg0, %c0_i32 : i32, i32
  }
  func.func @transform_8(%arg0: i32) -> (i32, i32) {
    %c0_i32 = arith.constant 0 : i32
    %c0_i32_0 = arith.constant 0 : i32
    return %arg0, %c0_i32 : i32, i32
  }
}

</mosaic_0001>

<bundles_post_ra>
// kernel: tpu_custom_call.1
= control target key start
LH: loop header
LB: loop body
LE: loop exit
PB: predicated region body
PF: predicated region fallthrough
CT: control target
= control target key end

     0   :  { %13 = vsyncpa [#allocation3], 0  ;;  %s793_s0 = inlined_call_operand.hbm [shape: f32[8,256], index: 0, kind: input, shape index: {}]   ;;  %s794_s1 = inlined_call_operand.hbm [shape: f32[256,256], index: 1, kind: input, shape index: {}]   ;;  %s795_s2 = inlined_call_operand.vmem [shape: f32[1,256], index: 2, kind: input, shape index: {}]   ;;  %s796_s3 = inlined_call_operand.hbm [shape: f32[256,256], index: 3, kind: input, shape index: {}]   ;;  %s797_s4 = inlined_call_operand.vmem [shape: f32[1,256], index: 4, kind: input, shape index: {}]   ;;  %s798_s5 = inlined_call_operand.hbm [shape: f32[256,128], index: 5, kind: input, shape index: {}]   ;;  %s799_s6 = inlined_call_operand.hbm [shape: f32[1,128], index: 6, kind: input, shape index: {}]   ;;  %s800_s7 = inlined_call_operand.vmem [shape: f32[8,128], index: 7, kind: input, shape index: {}]   ;;  %s801_s8 = inlined_call_operand.hbm [shape: f32[8,128], index: 8, kind: output, shape index: {}]  }
   0x1   :  { %14 = vsyncpa [#allocation6], 0 }
   0x2   :  { %15 = vsyncpa [#allocation9], 0 }
   0x3   :  { %16 = vsyncpa [#allocation4], 0  ;;  %s705_s27 = smov [#allocation5]  }
   0x4   :  { %s32_s28 = sshll.u32 %s705_s27, 4  ;;  %s33_s28 = int_to_ptr.vmem [resolvable:$true] %s32_s28 }
   0x5   :  { %s585_s29 = scalar_lea.vmem %s33_s28, 8192  ;;  %p590_p1 = scmp.lt.s32.totalorder %s33_s28, %s33_s28 }
   0x6   :  { %p586_p0 = scmp.ne.s32.totalorder %s33_s28, %s585_s29  ;;  %p591_p2 = scmp.lt.s32.totalorder %s585_s29, %s585_s29 }
   0x8   :  { %p592_p3 = por %p591_p2, %p590_p1 }
   0xa   :  { %p593_p4 = pnand %p592_p3, %p586_p0 }
   0xc   :  { %596 = shalt.err (!%p593_p4)
}
   0xd   :  { %s706_s30 = smov 256   ;;  %s707_s9 = smov 16  }
   0xe   :  { %38 = dma.hbm_to_vmem [thread:$0]  %s794_s1, 8192, %s33_s28, [#allocation6], %s706_s30, %s706_s30, %s707_s9  }
   0xf   :  { %s708_s12 = smov [#allocation8]  }
  0x10   :  { %s60_s13 = sshll.u32 %s708_s12, 4  ;;  %s61_s13 = int_to_ptr.vmem [resolvable:$true] %s60_s13 }
  0x11   :  { %s605_s14 = scalar_lea.vmem %s61_s13, 4096  ;;  %p610_p6 = scmp.lt.s32.totalorder %s61_s13, %s61_s13 }
  0x12   :  { %p606_p5 = scmp.ne.s32.totalorder %s61_s13, %s605_s14  ;;  %p611_p7 = scmp.lt.s32.totalorder %s605_s14, %s605_s14 }
  0x14   :  { %p612_p8 = por %p611_p7, %p610_p6 }
  0x16   :  { %p613_p9 = pnand %p612_p8, %p606_p5 }
  0x18   :  { %616 = shalt.err (!%p613_p9)
}
  0x19   :  { %s709_s15 = smov 128   ;;  %s710_s16 = smov 8  }
  0x1a   :  { %66 = dma.hbm_to_vmem [thread:$0]  %s798_s5, 4096, %s61_s13, [#allocation9], %s709_s15, %s709_s15, %s710_s16  }
  0x1b   :  { %s711_s19 = smov [#allocation2]   ;;  %s712_s21 = smov [#allocation7]  }
  0x1c   :  { %s23_s20 = sshll.u32 %s711_s19, 4  ;;  %s46_s1 = sshll.u32 %s712_s21, 4  ;;  %s24_s20 = int_to_ptr.vmem [resolvable:$true] %s23_s20  ;;  %s47_s1 = int_to_ptr.vmem [resolvable:$true] %s46_s1 }
  0x1d   :  { %s625_s22 = scalar_lea.vmem %s24_s20, 256  ;;  %p630_p11 = scmp.lt.s32.totalorder %s24_s20, %s24_s20 }
  0x1e   :  { %p626_p10 = scmp.ne.s32.totalorder %s24_s20, %s625_s22  ;;  %p631_p12 = scmp.lt.s32.totalorder %s625_s22, %s625_s22 }
  0x20   :  { %p632_p13 = por %p631_p12, %p630_p11 }
  0x22   :  { %p633_p0 = pnand %p632_p13, %p626_p10 }
  0x24   :  { %636 = shalt.err (!%p633_p0)
}
  0x25   :  { %26 = dma.hbm_to_vmem [thread:$0]  %s793_s0, 256, %s24_s20, [#allocation3]  }
  0x26   :  { %s645_s25 = scalar_lea.vmem %s47_s1, 8192  ;;  %p650_p2 = scmp.lt.s32.totalorder %s47_s1, %s47_s1 }
  0x27   :  { %p646_p1 = scmp.ne.s32.totalorder %s47_s1, %s645_s25  ;;  %p651_p3 = scmp.lt.s32.totalorder %s645_s25, %s645_s25 }
  0x29   :  { %p652_p4 = por %p651_p3, %p650_p2 }
  0x2b   :  { %p653_p5 = pnand %p652_p4, %p646_p1 }
  0x2d   :  { %656 = shalt.err (!%p653_p5)
}
  0x2e   :  { %52 = dma.hbm_to_vmem [thread:$0]  %s796_s3, 8192, %s47_s1, [#allocation6], %s706_s30, %s706_s30, %s707_s9  }
  0x2f   :  { %s713_s27 = smov [#allocation10]  }
  0x30   :  { %s73_s28 = sshll.u32 %s713_s27, 4  ;;  %s74_s28 = int_to_ptr.vmem [resolvable:$true] %s73_s28 }
  0x31   :  { %s665_s29 = scalar_lea.vmem %s74_s28, 16  ;;  %s669_s0 = scalar_lea.vmem %s74_s28, 32 }
  0x32   :  { %p666_p6 = scmp.ne.s32.totalorder %s74_s28, %s665_s29  ;;  %p670_p7 = scmp.lt.s32.totalorder %s74_s28, %s74_s28 }
  0x33   :  { %p671_p8 = scmp.lt.s32.totalorder %s669_s0, %s665_s29 }
  0x35   :  { %p672_p9 = por %p671_p8, %p670_p7 }
  0x37   :  { %p673_p10 = pnand %p672_p9, %p666_p6 }
  0x39   :  { %676 = shalt.err (!%p673_p10)
}
  0x3a   :  { %76 = dma.hbm_to_vmem [thread:$0]  %s799_s6, 16, %s74_s28, [#allocation9]  }
  0x3b   :  { %697 = dma.done.wait [#allocation3], 256  }
  0x3c   :  { %698 = vsyncadd [#allocation3], 4294967040 }
  0x3d   :  { %699 = dma.done.wait [#allocation6], 16384  }
  0x3e   :  { %700 = vsyncadd [#allocation6], 4294950912 }
  0x3f   :  { %701 = dma.done.wait [#allocation9], 4112  }
  0x40   :  { %702 = vsyncadd [#allocation9], 4294963184  ;;  %v127_v0 = vld [vmem:[#allocation5 + $0xf8] sm:$0xff]  ;;  %v126_v1 = vld [vmem:[#allocation5 + $0xf0] sm:$0xff] }
  0x41   :  { %v125_v2 = vld [vmem:[#allocation5 + $0xe8] sm:$0xff]  ;;  %172 = vmatprep.subr.mxu0 %v127_v0  ;;  %v124_v3 = vld [vmem:[#allocation5 + $0xe0] sm:$0xff]  ;;  %v123_v4 = vld [vmem:[#allocation5 + $0xd8] sm:$0xff] }
  0x42   :  { %173 = vmatpush1.msra.mxu0 %v126_v1  ;;  %v122_v5 = vld [vmem:[#allocation5 + $0xd0] sm:$0xff]  ;;  %v121_v6 = vld [vmem:[#allocation5 + $0xc8] sm:$0xff]  ;;  %v120_v7 = vld [vmem:[#allocation5 + $0xc0] sm:$0xff] }
  0x43   :  { %174 = vmatprep.subr.mxu0 %v125_v2  ;;  %v119_v8 = vld [vmem:[#allocation5 + $0xb8] sm:$0xff]  ;;  %v118_v9 = vld [vmem:[#allocation5 + $0xb0] sm:$0xff]  ;;  %v117_v10 = vld [vmem:[#allocation5 + $0xa8] sm:$0xff] }
  0x44   :  { %175 = vmatpush1.msra.mxu0 %v124_v3  ;;  %v116_v11 = vld [vmem:[#allocation5 + $0xa0] sm:$0xff]  ;;  %v115_v12 = vld [vmem:[#allocation5 + $0x98] sm:$0xff]  ;;  %v114_v13 = vld [vmem:[#allocation5 + $0x90] sm:$0xff] }
  0x45   :  { %176 = vmatprep.subr.mxu0 %v123_v4  ;;  %v113_v14 = vld [vmem:[#allocation5 + $0x88] sm:$0xff]  ;;  %v112_v15 = vld [vmem:[#allocation5 + $0x80] sm:$0xff]  ;;  %v111_v16 = vld [vmem:[#allocation5 + $0x78] sm:$0xff] }
  0x46   :  { %177 = vmatpush1.msra.mxu0 %v122_v5  ;;  %v110_v17 = vld [vmem:[#allocation5 + $0x70] sm:$0xff]  ;;  %v109_v18 = vld [vmem:[#allocation5 + $0x68] sm:$0xff]  ;;  %v108_v19 = vld [vmem:[#allocation5 + $0x60] sm:$0xff] }
  0x47   :  { %178 = vmatprep.subr.mxu0 %v121_v6  ;;  %v107_v20 = vld [vmem:[#allocation5 + $0x58] sm:$0xff]  ;;  %v106_v21 = vld [vmem:[#allocation5 + $0x50] sm:$0xff]  ;;  %v105_v22 = vld [vmem:[#allocation5 + $0x48] sm:$0xff] }
  0x48   :  { %179 = vmatpush1.msra.mxu0 %v120_v7  ;;  %v104_v23 = vld [vmem:[#allocation5 + $0x40] sm:$0xff]  ;;  %v103_v24 = vld [vmem:[#allocation5 + $0x38] sm:$0xff]  ;;  %v277_v27 = vld [vmem:[#allocation7 + $0xf0] sm:$0xff] }
  0x49   :  { %180 = vmatprep.subr.mxu0 %v119_v8  ;;  %v95_v25 = vld [vmem:[#allocation2 + $0x8] sm:$0xff]  ;;  %v276_v28 = vld [vmem:[#allocation7 + $0xe8] sm:$0xff]  ;;  %v102_v29 = vld [vmem:[#allocation5 + $0x30] sm:$0xff] }
  0x4a   :  { %181 = vmatpush1.msra.mxu0 %v118_v9  ;;  %236 = vmatprep.mubr.f32.mxu0 %v95_v25  ;;  %v278_v26 = vld [vmem:[#allocation7 + $0xf8] sm:$0xff]  ;;  %v275_v30 = vld [vmem:[#allocation7 + $0xe0] sm:$0xff]  ;;  %v101_v31 = vld [vmem:[#allocation5 + $0x28] sm:$0xff] }
  0x4b   :  { %182 = vmatprep.subr.mxu0 %v117_v10  ;;  %323 = vmatprep.subr.mxu1 %v278_v26  ;;  %v274_v32 = vld [vmem:[#allocation7 + $0xd8] sm:$0xff]  ;;  %v100_v33 = vld [vmem:[#allocation5 + $0x20] sm:$0xff]  ;;  %v273_v34 = vld [vmem:[#allocation7 + $0xd0] sm:$0xff] }
  0x4c   :  { %183 = vmatpush1.msra.mxu0 %v116_v11  ;;  %324 = vmatpush1.msra.mxu1 %v277_v27  ;;  %v99_v35 = vld [vmem:[#allocation5 + $0x18] sm:$0xff]  ;;  %v272_v36 = vld [vmem:[#allocation7 + $0xc8] sm:$0xff]  ;;  %v98_v37 = vld [vmem:[#allocation5 + $0x10] sm:$0xff] }
  0x4d   :  { %184 = vmatprep.subr.mxu0 %v115_v12  ;;  %325 = vmatprep.subr.mxu1 %v276_v28  ;;  %v271_v38 = vld [vmem:[#allocation7 + $0xc0] sm:$0xff]  ;;  %v97_v39 = vld [vmem:[#allocation5 + $0x8] sm:$0xff]  ;;  %v270_v40 = vld [vmem:[#allocation7 + $0xb8] sm:$0xff] }
  0x4e   :  { %185 = vmatpush1.msra.mxu0 %v114_v13  ;;  %326 = vmatpush1.msra.mxu1 %v275_v30  ;;  %v96_v41 = vld [vmem:[#allocation5] sm:$0xff]  ;;  %v269_v42 = vld [vmem:[#allocation7 + $0xb0] sm:$0xff]  ;;  %v159_v43 = vld [vmem:[#allocation5 + $0x1f8] sm:$0xff] }
  0x4f   :  { %186 = vmatprep.subr.mxu0 %v113_v14  ;;  %327 = vmatprep.subr.mxu1 %v274_v32  ;;  %v268_v44 = vld [vmem:[#allocation7 + $0xa8] sm:$0xff]  ;;  %v158_v45 = vld [vmem:[#allocation5 + $0x1f0] sm:$0xff]  ;;  %v267_v46 = vld [vmem:[#allocation7 + $0xa0] sm:$0xff] }
  0x50   :  { %187 = vmatpush1.msra.mxu0 %v112_v15  ;;  %328 = vmatpush1.msra.mxu1 %v273_v34  ;;  %v157_v47 = vld [vmem:[#allocation5 + $0x1e8] sm:$0xff]  ;;  %v266_v48 = vld [vmem:[#allocation7 + $0x98] sm:$0xff]  ;;  %v156_v49 = vld [vmem:[#allocation5 + $0x1e0] sm:$0xff] }
  0x51   :  { %188 = vmatprep.subr.mxu0 %v111_v16  ;;  %329 = vmatprep.subr.mxu1 %v272_v36  ;;  %v265_v50 = vld [vmem:[#allocation7 + $0x90] sm:$0xff]  ;;  %v155_v51 = vld [vmem:[#allocation5 + $0x1d8] sm:$0xff]  ;;  %v264_v52 = vld [vmem:[#allocation7 + $0x88] sm:$0xff] }
  0x52   :  { %189 = vmatpush1.msra.mxu0 %v110_v17  ;;  %330 = vmatpush1.msra.mxu1 %v271_v38  ;;  %v154_v53 = vld [vmem:[#allocation5 + $0x1d0] sm:$0xff]  ;;  %v263_v54 = vld [vmem:[#allocation7 + $0x80] sm:$0xff]  ;;  %v153_v55 = vld [vmem:[#allocation5 + $0x1c8] sm:$0xff] }
  0x53   :  { %190 = vmatprep.subr.mxu0 %v109_v18  ;;  %331 = vmatprep.subr.mxu1 %v270_v40  ;;  %v262_v56 = vld [vmem:[#allocation7 + $0x78] sm:$0xff]  ;;  %v152_v57 = vld [vmem:[#allocation5 + $0x1c0] sm:$0xff]  ;;  %v261_v58 = vld [vmem:[#allocation7 + $0x70] sm:$0xff] }
  0x54   :  { %191 = vmatpush1.msra.mxu0 %v108_v19  ;;  %332 = vmatpush1.msra.mxu1 %v269_v42  ;;  %v151_v59 = vld [vmem:[#allocation5 + $0x1b8] sm:$0xff]  ;;  %v260_v60 = vld [vmem:[#allocation7 + $0x68] sm:$0xff]  ;;  %v150_v61 = vld [vmem:[#allocation5 + $0x1b0] sm:$0xff] }
  0x55   :  { %192 = vmatprep.subr.mxu0 %v107_v20  ;;  %333 = vmatprep.subr.mxu1 %v268_v44  ;;  %v259_v62 = vld [vmem:[#allocation7 + $0x60] sm:$0xff]  ;;  %v149_v63 = vld [vmem:[#allocation5 + $0x1a8] sm:$0xff]  ;;  %v258_v0 = vld [vmem:[#allocation7 + $0x58] sm:$0xff] }
  0x56   :  { %193 = vmatpush1.msra.mxu0 %v106_v21  ;;  %334 = vmatpush1.msra.mxu1 %v267_v46  ;;  %v148_v1 = vld [vmem:[#allocation5 + $0x1a0] sm:$0xff]  ;;  %v257_v2 = vld [vmem:[#allocation7 + $0x50] sm:$0xff]  ;;  %v147_v3 = vld [vmem:[#allocation5 + $0x198] sm:$0xff] }
  0x57   :  { %194 = vmatprep.subr.mxu0 %v105_v22  ;;  %335 = vmatprep.subr.mxu1 %v266_v48  ;;  %v256_v4 = vld [vmem:[#allocation7 + $0x48] sm:$0xff]  ;;  %v146_v5 = vld [vmem:[#allocation5 + $0x190] sm:$0xff]  ;;  %v255_v6 = vld [vmem:[#allocation7 + $0x40] sm:$0xff] }
  0x58   :  { %195 = vmatpush1.msra.mxu0 %v104_v23  ;;  %336 = vmatpush1.msra.mxu1 %v265_v50  ;;  %v145_v7 = vld [vmem:[#allocation5 + $0x188] sm:$0xff]  ;;  %v254_v8 = vld [vmem:[#allocation7 + $0x38] sm:$0xff]  ;;  %v144_v9 = vld [vmem:[#allocation5 + $0x180] sm:$0xff] }
  0x59   :  { %196 = vmatprep.subr.mxu0 %v103_v24  ;;  %337 = vmatprep.subr.mxu1 %v264_v52  ;;  %v253_v10 = vld [vmem:[#allocation7 + $0x30] sm:$0xff]  ;;  %v143_v11 = vld [vmem:[#allocation5 + $0x178] sm:$0xff]  ;;  %v252_v12 = vld [vmem:[#allocation7 + $0x28] sm:$0xff] }
  0x5a   :  { %197 = vmatpush1.msra.mxu0 %v102_v29  ;;  %338 = vmatpush1.msra.mxu1 %v263_v54  ;;  %v142_v13 = vld [vmem:[#allocation5 + $0x170] sm:$0xff]  ;;  %v251_v14 = vld [vmem:[#allocation7 + $0x20] sm:$0xff]  ;;  %v141_v15 = vld [vmem:[#allocation5 + $0x168] sm:$0xff] }
  0x5b   :  { %198 = vmatprep.subr.mxu0 %v101_v31  ;;  %339 = vmatprep.subr.mxu1 %v262_v56  ;;  %v250_v16 = vld [vmem:[#allocation7 + $0x18] sm:$0xff]  ;;  %v140_v17 = vld [vmem:[#allocation5 + $0x160] sm:$0xff]  ;;  %v249_v18 = vld [vmem:[#allocation7 + $0x10] sm:$0xff] }
  0x5c   :  { %199 = vmatpush1.msra.mxu0 %v100_v33  ;;  %340 = vmatpush1.msra.mxu1 %v261_v58  ;;  %v139_v19 = vld [vmem:[#allocation5 + $0x158] sm:$0xff]  ;;  %v248_v20 = vld [vmem:[#allocation7 + $0x8] sm:$0xff]  ;;  %v138_v21 = vld [vmem:[#allocation5 + $0x150] sm:$0xff] }
  0x5d   :  { %200 = vmatprep.subr.mxu0 %v99_v35  ;;  %341 = vmatprep.subr.mxu1 %v260_v60  ;;  %v247_v22 = vld [vmem:[#allocation7] sm:$0xff]  ;;  %v137_v23 = vld [vmem:[#allocation5 + $0x148] sm:$0xff]  ;;  %v310_v24 = vld [vmem:[#allocation7 + $0x1f8] sm:$0xff] }
  0x5e   :  { %201 = vmatpush1.msra.mxu0 %v98_v37  ;;  %342 = vmatpush1.msra.mxu1 %v259_v62  ;;  %v136_v25 = vld [vmem:[#allocation5 + $0x140] sm:$0xff]  ;;  %v309_v26 = vld [vmem:[#allocation7 + $0x1f0] sm:$0xff]  ;;  %v135_v27 = vld [vmem:[#allocation5 + $0x138] sm:$0xff] }
  0x5f   :  { %202 = vmatprep.subr.mxu0 %v97_v39  ;;  %343 = vmatprep.subr.mxu1 %v258_v0  ;;  %v308_v28 = vld [vmem:[#allocation7 + $0x1e8] sm:$0xff]  ;;  %v134_v29 = vld [vmem:[#allocation5 + $0x130] sm:$0xff]  ;;  %v307_v30 = vld [vmem:[#allocation7 + $0x1e0] sm:$0xff] }
  0x60   :  { %203 = vmatpush1.msra.mxu0 %v96_v41  ;;  %344 = vmatpush1.msra.mxu1 %v257_v2  ;;  %v133_v31 = vld [vmem:[#allocation5 + $0x128] sm:$0xff]  ;;  %v306_v32 = vld [vmem:[#allocation7 + $0x1d8] sm:$0xff]  ;;  %v132_v33 = vld [vmem:[#allocation5 + $0x120] sm:$0xff] }
  0x61   :  { %204 = vmatprep.subr.mxu0 %v159_v43  ;;  %345 = vmatprep.subr.mxu1 %v256_v4  ;;  %v305_v34 = vld [vmem:[#allocation7 + $0x1d0] sm:$0xff]  ;;  %v131_v35 = vld [vmem:[#allocation5 + $0x118] sm:$0xff]  ;;  %v304_v36 = vld [vmem:[#allocation7 + $0x1c8] sm:$0xff] }
  0x62   :  { %205 = vmatpush2.msra.mxu0 %v158_v45  ;;  %346 = vmatpush1.msra.mxu1 %v255_v6  ;;  %v130_v37 = vld [vmem:[#allocation5 + $0x110] sm:$0xff]  ;;  %v303_v38 = vld [vmem:[#allocation7 + $0x1c0] sm:$0xff]  ;;  %v129_v39 = vld [vmem:[#allocation5 + $0x108] sm:$0xff] }
  0x63   :  { %206 = vmatprep.subr.mxu0 %v157_v47  ;;  %347 = vmatprep.subr.mxu1 %v254_v8  ;;  %v302_v40 = vld [vmem:[#allocation7 + $0x1b8] sm:$0xff]  ;;  %v128_v41 = vld [vmem:[#allocation5 + $0x100] sm:$0xff]  ;;  %v301_v42 = vld [vmem:[#allocation7 + $0x1b0] sm:$0xff] }
  0x64   :  { %207 = vmatpush2.msra.mxu0 %v156_v49  ;;  %348 = vmatpush1.msra.mxu1 %v253_v10  ;;  %v94_v43 = vld [vmem:[#allocation2] sm:$0xff]  ;;  %v300_v44 = vld [vmem:[#allocation7 + $0x1a8] sm:$0xff]  ;;  %v299_v45 = vld [vmem:[#allocation7 + $0x1a0] sm:$0xff] }
  0x65   :  { %208 = vmatprep.subr.mxu0 %v155_v51  ;;  %349 = vmatprep.subr.mxu1 %v252_v12  ;;  %v298_v46 = vld [vmem:[#allocation7 + $0x198] sm:$0xff]  ;;  %v297_v47 = vld [vmem:[#allocation7 + $0x190] sm:$0xff]  ;;  %v296_v48 = vld [vmem:[#allocation7 + $0x188] sm:$0xff] }
  0x66   :  { %209 = vmatpush2.msra.mxu0 %v154_v53  ;;  %350 = vmatpush1.msra.mxu1 %v251_v14  ;;  %v295_v49 = vld [vmem:[#allocation7 + $0x180] sm:$0xff]  ;;  %v294_v50 = vld [vmem:[#allocation7 + $0x178] sm:$0xff]  ;;  %v293_v51 = vld [vmem:[#allocation7 + $0x170] sm:$0xff] }
  0x67   :  { %210 = vmatprep.subr.mxu0 %v153_v55  ;;  %351 = vmatprep.subr.mxu1 %v250_v16  ;;  %v292_v52 = vld [vmem:[#allocation7 + $0x168] sm:$0xff]  ;;  %v291_v53 = vld [vmem:[#allocation7 + $0x160] sm:$0xff]  ;;  %v290_v54 = vld [vmem:[#allocation7 + $0x158] sm:$0xff] }
  0x68   :  { %211 = vmatpush2.msra.mxu0 %v152_v57  ;;  %352 = vmatpush1.msra.mxu1 %v249_v18  ;;  %v289_v55 = vld [vmem:[#allocation7 + $0x150] sm:$0xff]  ;;  %v288_v56 = vld [vmem:[#allocation7 + $0x148] sm:$0xff]  ;;  %v287_v57 = vld [vmem:[#allocation7 + $0x140] sm:$0xff] }
  0x69   :  { %212 = vmatprep.subr.mxu0 %v151_v59  ;;  %353 = vmatprep.subr.mxu1 %v248_v20  ;;  %v286_v58 = vld [vmem:[#allocation7 + $0x138] sm:$0xff]  ;;  %v285_v59 = vld [vmem:[#allocation7 + $0x130] sm:$0xff]  ;;  %v284_v60 = vld [vmem:[#allocation7 + $0x128] sm:$0xff] }
  0x6a   :  { %213 = vmatpush2.msra.mxu0 %v150_v61  ;;  %354 = vmatpush1.msra.mxu1 %v247_v22  ;;  %v283_v61 = vld [vmem:[#allocation7 + $0x120] sm:$0xff]  ;;  %v282_v62 = vld [vmem:[#allocation7 + $0x118] sm:$0xff]  ;;  %v280_v0 = vld [vmem:[#allocation7 + $0x108] sm:$0xff] }
  0x6b   :  { %214 = vmatprep.subr.mxu0 %v149_v63  ;;  %355 = vmatprep.subr.mxu1 %v310_v24  ;;  %v281_v63 = vld [vmem:[#allocation7 + $0x110] sm:$0xff]  ;;  %v429_v2 = vld [vmem:[#allocation8 + $0xf8] sm:$0xff]  ;;  %v427_v6 = vld [vmem:[#allocation8 + $0xe8] sm:$0xff]  ;;  %v162_v24 = vlaneseq }
  0x6c   :  { %215 = vmatpush2.msra.mxu0 %v148_v1  ;;  %356 = vmatpush2.msra.mxu1 %v309_v26  ;;  %v279_v1 = vld [vmem:[#allocation7 + $0x100] sm:$0xff]  ;;  %v428_v4 = vld [vmem:[#allocation8 + $0xf0] sm:$0xff]  ;;  %v425_v10 = vld [vmem:[#allocation8 + $0xd8] sm:$0xff] }
  0x6d   :  { %216 = vmatprep.subr.mxu0 %v147_v3  ;;  %357 = vmatprep.subr.mxu1 %v308_v28  ;;  %v413_v3 = vld [vmem:[#allocation8 + $0x78] sm:$0xff]  ;;  %v426_v8 = vld [vmem:[#allocation8 + $0xe0] sm:$0xff]  ;;  %v424_v12 = vld [vmem:[#allocation8 + $0xd0] sm:$0xff] }
  0x6e   :  { %217 = vmatpush2.msra.mxu0 %v146_v5  ;;  %358 = vmatpush2.msra.mxu1 %v307_v30  ;;  %v412_v5 = vld [vmem:[#allocation8 + $0x70] sm:$0xff]  ;;  %v423_v14 = vld [vmem:[#allocation8 + $0xc8] sm:$0xff]  ;;  %v422_v16 = vld [vmem:[#allocation8 + $0xc0] sm:$0xff] }
  0x6f   :  { %218 = vmatprep.subr.mxu0 %v145_v7  ;;  %359 = vmatprep.subr.mxu1 %v306_v32  ;;  %v411_v7 = vld [vmem:[#allocation8 + $0x68] sm:$0xff]  ;;  %v421_v18 = vld [vmem:[#allocation8 + $0xb8] sm:$0xff]  ;;  %v420_v20 = vld [vmem:[#allocation8 + $0xb0] sm:$0xff] }
  0x70   :  { %219 = vmatpush2.msra.mxu0 %v144_v9  ;;  %360 = vmatpush2.msra.mxu1 %v305_v34  ;;  %v410_v9 = vld [vmem:[#allocation8 + $0x60] sm:$0xff]  ;;  %v419_v22 = vld [vmem:[#allocation8 + $0xa8] sm:$0xff] }
  0x71   :  { %220 = vmatprep.subr.mxu0 %v143_v11  ;;  %361 = vmatprep.subr.mxu1 %v304_v36  ;;  %v409_v11 = vld [vmem:[#allocation8 + $0x58] sm:$0xff] }
  0x72   :  { %221 = vmatpush2.msra.mxu0 %v142_v13  ;;  %362 = vmatpush2.msra.mxu1 %v303_v38  ;;  %v408_v13 = vld [vmem:[#allocation8 + $0x50] sm:$0xff] }
  0x73   :  { %222 = vmatprep.subr.mxu0 %v141_v15  ;;  %363 = vmatprep.subr.mxu1 %v302_v40  ;;  %v407_v15 = vld [vmem:[#allocation8 + $0x48] sm:$0xff]  ;;  %v402_v40 = vld [vmem:[#allocation8 + $0x20] sm:$0xff] }
  0x74   :  { %223 = vmatpush2.msra.mxu0 %v140_v17  ;;  %364 = vmatpush2.msra.mxu1 %v301_v42  ;;  %v406_v17 = vld [vmem:[#allocation8 + $0x40] sm:$0xff]  ;;  %v401_v42 = vld [vmem:[#allocation8 + $0x18] sm:$0xff] }
  0x75   :  { %224 = vmatprep.subr.mxu0 %v139_v19  ;;  %365 = vmatprep.subr.mxu1 %v300_v44  ;;  %v405_v19 = vld [vmem:[#allocation8 + $0x38] sm:$0xff]  ;;  %v400_v44 = vld [vmem:[#allocation8 + $0x10] sm:$0xff] }
  0x76   :  { %225 = vmatpush2.msra.mxu0 %v138_v21  ;;  %366 = vmatpush2.msra.mxu1 %v299_v45  ;;  %v404_v21 = vld [vmem:[#allocation8 + $0x30] sm:$0xff]  ;;  %v415_v45 = vld [vmem:[#allocation8 + $0x88] sm:$0xff] }
  0x77   :  { %226 = vmatprep.subr.mxu0 %v137_v23  ;;  %367 = vmatprep.subr.mxu1 %v298_v46  ;;  %v403_v23 = vld [vmem:[#allocation8 + $0x28] sm:$0xff] }
  0x78   :  { %227 = vmatpush2.msra.mxu0 %v136_v25  ;;  %368 = vmatpush2.msra.mxu1 %v297_v47  ;;  %v163_v25 = vshrl.u32 %v162_v24, 7  ;;  %v399_v46 = vld [vmem:[#allocation8 + $0x8] sm:$0xff]  ;;  %v414_v47 = vld [vmem:[#allocation8 + $0x80] sm:$0xff] }
  0x79   :  { %228 = vmatprep.subr.mxu0 %v135_v27  ;;  %369 = vmatprep.subr.mxu1 %v296_v48  ;;  %v160_v27 = vld [vmem:[%s795_s2] sm:$0x3]  ;;  %v398_v48 = vld [vmem:[#allocation8] sm:$0xff] }
  0x7a   :  { %229 = vmatpush2.msra.mxu0 %v134_v29  ;;  %370 = vmatpush2.msra.mxu1 %v295_v49  ;;  %v164_v26 = vsub.s32 0, %v163_v25  ;;  %v168_v28 = vsub.s32 1, %v163_v25  ;;  %v311_v49 = vld [vmem:[%s797_s4] sm:$0x3]  ;;  %s714_s4 = smov [#allocation11]  }
  0x7b   :  { %230 = vmatprep.subr.mxu0 %v133_v31  ;;  %371 = vmatprep.subr.mxu1 %v294_v50  ;;  %s520_s13 = sshll.u32 %s714_s4, 4  ;;  %s521_s13 = int_to_ptr.vmem [resolvable:$true] %s520_s13 }
  0x7c   :  { %231 = vmatpush2.msra.mxu0 %v132_v33  ;;  %372 = vmatpush2.msra.mxu1 %v293_v51  ;;  %v165_v29 = vrot.slane %v160_v27, %v164_v26  ;;  %v169_v30 = vrot.slane %v160_v27, %v168_v28  ;;  %v316_v50 = vrot.slane %v311_v49, %v164_v26  ;;  %s677_s14 = scalar_lea.vmem %s521_s13, 128  ;;  %p682_p12 = scmp.lt.s32.totalorder %s521_s13, %s521_s13 }
  0x7d   :  { %232 = vmatprep.subr.mxu0 %v131_v35  ;;  %373 = vmatprep.subr.mxu1 %v292_v52  ;;  %v320_v51 = vrot.slane %v311_v49, %v168_v28  ;;  %p678_p11 = scmp.ne.s32.totalorder %s521_s13, %s677_s14  ;;  %p683_p13 = scmp.lt.s32.totalorder %s677_s14, %s677_s14 }
  0x7e   :  { %233 = vmatpush2.msra.mxu0 %v130_v37  ;;  %374 = vmatpush2.msra.mxu1 %v291_v53 }
  0x7f   :  { %234 = vmatprep.subr.mxu0 %v129_v39  ;;  %375 = vmatprep.subr.mxu1 %v290_v54  ;;  %v418_v39 = vld [vmem:[#allocation8 + $0xa0] sm:$0xff]  ;;  %p684_p0 = por %p683_p13, %p682_p12 }
  0x80   :  { %235 = vmatpush2.msra.mxu0 %v128_v41  ;;  %376 = vmatpush2.msra.mxu1 %v289_v55  ;;  %v417_v41 = vld [vmem:[#allocation8 + $0x98] sm:$0xff] }
  0x81   :  { %237 = vmatmul.mubr.f32.vlgmr.msra.gmra.mxu0 %v94_v43  ;;  %377 = vmatprep.subr.mxu1 %v288_v56  ;;  %v416_v43 = vld [vmem:[#allocation8 + $0x90] sm:$0xff]  ;;  %p685_p1 = pnand %p684_p0, %p678_p11 }
  0x82   :  { %378 = vmatpush2.msra.mxu1 %v287_v57  ;;  %532 = vmatprep.subr.mxu0 %v429_v2 }
  0x83   :  { %379 = vmatprep.subr.mxu1 %v286_v58  ;;  %533 = vmatpush3.msra.mxu0 %v413_v3 }
  0x84   :  { %380 = vmatpush2.msra.mxu1 %v285_v59  ;;  %534 = vmatprep.subr.mxu0 %v428_v4 }
  0x85   :  { %381 = vmatprep.subr.mxu1 %v284_v60  ;;  %535 = vmatpush3.msra.mxu0 %v412_v5 }
  0x86   :  { %382 = vmatpush2.msra.mxu1 %v283_v61  ;;  %536 = vmatprep.subr.mxu0 %v427_v6  ;;  %v507_v61 = vld [vmem:[%s800_s7] sm:$0xff] }
  0x87   :  { %383 = vmatprep.subr.mxu1 %v282_v62  ;;  %537 = vmatpush3.msra.mxu0 %v411_v7  ;;  %v531_v62 = vld [vmem:[#allocation10] ss:$0 sm:$0xff] }
  0x88   :  { %384 = vmatpush2.msra.mxu1 %v281_v63  ;;  %538 = vmatprep.subr.mxu0 %v426_v8 }
  0x89   :  { %385 = vmatprep.subr.mxu1 %v280_v0  ;;  %539 = vmatpush3.msra.mxu0 %v410_v9 }
  0x8a   :  { %386 = vmatpush2.msra.mxu1 %v279_v1  ;;  %540 = vmatprep.subr.mxu0 %v425_v10  ;;  %v510_v1 = vmul.f32 0.5, %v507_v61 }
  0x8b   :  { %541 = vmatpush3.msra.mxu0 %v409_v11 }
  0x8c   :  { %542 = vmatprep.subr.mxu0 %v424_v12  ;;  %v511_v4 = vmul.f32 %v510_v1, %v507_v61 }
  0x8d   :  { %543 = vmatpush3.msra.mxu0 %v408_v13 }
  0x8e   :  { %544 = vmatprep.subr.mxu0 %v423_v14 }
  0x8f   :  { %545 = vmatpush3.msra.mxu0 %v407_v15 }
  0x90   :  { %546 = vmatprep.subr.mxu0 %v422_v16 }
  0x91   :  { %547 = vmatpush3.msra.mxu0 %v406_v17 }
  0x92   :  { %548 = vmatprep.subr.mxu0 %v421_v18 }
  0x93   :  { %549 = vmatpush3.msra.mxu0 %v405_v19 }
  0x94   :  { %550 = vmatprep.subr.mxu0 %v420_v20 }
  0x95   :  { %551 = vmatpush3.msra.mxu0 %v404_v21 }
  0x96   :  { %552 = vmatprep.subr.mxu0 %v419_v22 }
  0x97   :  { %553 = vmatpush3.msra.mxu0 %v403_v23 }
  0x98   :  { %554 = vmatprep.subr.mxu0 %v418_v39 }
  0x99   :  { %555 = vmatpush3.msra.mxu0 %v402_v40 }
  0x9a   :  { %556 = vmatprep.subr.mxu0 %v417_v41 }
  0x9b   :  { %557 = vmatpush3.msra.mxu0 %v401_v42 }
  0x9c   :  { %558 = vmatprep.subr.mxu0 %v416_v43 }
  0x9d   :  { %559 = vmatpush3.msra.mxu0 %v400_v44 }
  0x9e   :  { %560 = vmatprep.subr.mxu0 %v415_v45 }
  0x9f   :  { %561 = vmatpush3.msra.mxu0 %v399_v46 }
  0xa0   :  { %562 = vmatprep.subr.mxu0 %v414_v47 }
  0xa1   :  { %563 = vmatpush3.msra.mxu0 %v398_v48 }
 0x141   :  { %v238_v31 = vpop.f32.mrf.mxu0 }
 0x142   :  { %v239_v32 = vadd.f32 %v238_v31, %v165_v29 }
 0x143   :  { %v240_v33 = vpop.f32.mrf.mxu0 }
 0x144   :  { %v241_v34 = vadd.f32 %v240_v33, %v169_v30  ;;  %v243_v35 = vmul.f32 0.01, %v239_v32 }
 0x146   :  { %v244_v36 = vmul.f32 0.01, %v241_v34  ;;  %v245_v38 = vmax.f32 %v239_v32, %v243_v35 }
 0x148   :  { %v246_v37 = vmax.f32 %v241_v34, %v244_v36 }
 0x14a   :  { %387 = vmatprep.mubr.f32.mxu1 %v246_v37 }
 0x14b   :  { %388 = vmatmul.mubr.f32.vlgmr.msra.gmra.mxu1 %v245_v38 }
 0x20b   :  { %v389_v52 = vpop.f32.mrf.mxu1 }
 0x20c   :  { %v390_v53 = vadd.f32 %v389_v52, %v316_v50 }
 0x20d   :  { %v391_v54 = vpop.f32.mrf.mxu1 }
 0x20e   :  { %v392_v55 = vadd.f32 %v391_v54, %v320_v51  ;;  %v394_v56 = vmul.f32 0.01, %v390_v53 }
 0x210   :  { %v395_v57 = vmul.f32 0.01, %v392_v55  ;;  %v396_v59 = vmax.f32 %v390_v53, %v394_v56 }
 0x212   :  { %v397_v58 = vmax.f32 %v392_v55, %v395_v57 }
 0x214   :  { %501 = vmatprep.mubr.f32.mxu0 %v397_v58 }
 0x215   :  { %502 = vmatmul.mubr.f32.vlgmr.msra.gmra.mxu0 %v396_v59 }
 0x2d5   :  { %v564_v60 = vpop.f32.mrf.mxu0 }
 0x2d7   :  { %v565_v63 = vpop.f32.mrf.mxu0 }
 0x2d8   :  { %v566_v0 = vadd.f32 %v565_v63, %v564_v60 }
 0x2da   :  { %v504_v2 = vadd.f32 %v566_v0, %v531_v62 }
 0x2dc   :  { %v508_v3 = vmul.f32 0.5, %v504_v2 }
 0x2de   :  { %v509_v5 = vsub.f32 -0.9189385, %v508_v3 }
 0x2e0   :  { %v512_v6 = vsub.f32 %v509_v5, %v511_v4 }
 0x2e2   :  { %513 = vst [vmem:[#allocation11] sm:$0xff] %v512_v6 }
 0x2e3   :  { %688 = shalt.err (!%p685_p1)
}
 0x2e4   :  { %523 = dma.vmem_to_hbm [thread:$0]  %s521_s13, 128, %s801_s8, [#allocation4]  }
 0x2e5   :  { %703 = dma.done.wait [#allocation4], 128  }
 0x2e6   :  { %704 = vsyncadd [#allocation4], 4294967168 }
 0x2e7   :  { %527 = vsyncpa [#allocation3], 1 }
 0x2e8   :  { %528 = vsyncpa [#allocation6], 1 }
 0x2e9   :  { %529 = vsyncpa [#allocation9], 1 }
 0x2ea   :  { %530 = vsyncpa [#allocation4], 1 }

</bundles_post_ra>
